<compile_context>
chip_gen: v7x
topology: tpu7x:2x2x1
jax: 0.10.0
libtpu: 0.0.40
codegen_flags: <defaults>
</compile_context>

<pallas_src>
import jax
import jax.numpy as jnp
from jax.experimental import pallas as pl
from jax.experimental.pallas import tpu as pltpu

LANE = 128      # feature dims padded to full lane width (unmasked stores, aligned MXU K/N)
SUBLANE = 8     # node counts padded to sublane multiples


def _round_up(n, m):
    return (n + m - 1) // m * m


def _tile_and_pad(n, pref):
    """Return (tile, padded_size) for a node axis: full dim if it fits one tile,
    otherwise the preferred tile with the axis padded to a multiple of it."""
    n8 = _round_up(n, SUBLANE)
    if n8 <= pref:
        return n8, n8
    return pref, _round_up(n8, pref)


def _pick_tk(src_pad, tk_pref):
    """src (reduction) tile: must be a multiple of 128 or the full dim."""
    if src_pad <= tk_pref:
        return src_pad
    for t in (tk_pref, 256, 128):
        if src_pad % t == 0:
            return t
    return src_pad  # fallback: single src tile (whole reduction resident)


def _make_layer_kernel(apply_log, apply_act_norm):
    """One SAGEConv('mean') layer.

    grid = (dst_tiles, src_tiles); src axis is the reduction (last, arbitrary).
    Refs: h_dst, h_src, adj, inv_deg, W_self, W_neigh, bias, out, acc(scratch).
    """
    def kernel(hdst_ref, hsrc_ref, adj_ref, invdeg_ref,
               wself_ref, wneigh_ref, bias_ref, out_ref, acc_ref):
        k = pl.program_id(1)

        @pl.when(k == 0)
        def _():
            acc_ref[...] = jnp.zeros_like(acc_ref)

        # ---- aggregate: acc += adj_tile @ h_src_tile (bf16 MXU, f32 acc) ----
        hs = hsrc_ref[...]
        if apply_log:
            hs = jnp.log(hs + 1.0)                    # th.log(x + 1), padding stays 0
        hs = hs.astype(jnp.bfloat16)
        acc_ref[...] += jnp.dot(adj_ref[...], hs,
                                preferred_element_type=jnp.float32)

        @pl.when(k == pl.num_programs(1) - 1)
        def _():
            # mean = sum * (1/deg); inv_deg is exact f32 precomputed on host
            agg = (acc_ref[...] * invdeg_ref[...]).astype(jnp.bfloat16)

            hd = hdst_ref[...]                         # dst nodes == first src rows (DGL)
            if apply_log:
                hd = jnp.log(hd + 1.0)
            hd = hd.astype(jnp.bfloat16)

            # Two K=128 dots accumulated in f32 (no lane-dim concatenate).
            h = jnp.dot(hd, wself_ref[...], preferred_element_type=jnp.float32)
            h = h + jnp.dot(agg, wneigh_ref[...], preferred_element_type=jnp.float32)
            h = h + bias_ref[...]

            if apply_act_norm:
                # activation=F.relu, norm=F.normalize(dim=-1), eps=1e-12
                h = jnp.maximum(h, 0.0)
                ssq = jnp.sum(h * h, axis=-1, keepdims=True)
                h = h * jax.lax.rsqrt(jnp.maximum(ssq, 1e-24))

            # NOTE: padded dst rows end up as f(bias); they are only ever read
            # through zero adjacency columns in the next layer and sliced off at
            # the end — keep this invariant if the padding scheme changes.
            out_ref[...] = h.astype(out_ref.dtype)

    return kernel


def _sage_layer(h, adj_b, inv_deg, w_self, w_neigh, bias, *,
                tm, tk, apply_log, apply_act_norm, out_dtype):
    dst_pad = adj_b.shape[0]
    src_pad = adj_b.shape[1]
    grid = (dst_pad // tm, src_pad // tk)

    kernel = _make_layer_kernel(apply_log, apply_act_norm)
    return pl.pallas_call(
        kernel,
        out_shape=jax.ShapeDtypeStruct((dst_pad, LANE), out_dtype),
        grid_spec=pltpu.PrefetchScalarGridSpec(
            num_scalar_prefetch=0,
            grid=grid,
            in_specs=[
                pl.BlockSpec((tm, LANE), lambda i, k: (i, 0)),    # h_dst (first rows of h)
                pl.BlockSpec((tk, LANE), lambda i, k: (k, 0)),    # h_src (streamed)
                pl.BlockSpec((tm, tk),   lambda i, k: (i, k)),    # adj 0/1 bf16 (streamed)
                pl.BlockSpec((tm, 1),    lambda i, k: (i, 0)),    # inv_deg f32
                pl.BlockSpec((LANE, LANE), lambda i, k: (0, 0)),  # W_self (resident)
                pl.BlockSpec((LANE, LANE), lambda i, k: (0, 0)),  # W_neigh (resident)
                pl.BlockSpec((1, LANE),  lambda i, k: (0, 0)),    # bias (resident)
            ],
            out_specs=pl.BlockSpec((tm, LANE), lambda i, k: (i, 0)),
            scratch_shapes=[pltpu.VMEM((tm, LANE), jnp.float32)],
        ),
        compiler_params=pltpu.CompilerParams(
            dimension_semantics=("parallel", "arbitrary"),
            vmem_limit_bytes=32 * 1024 * 1024,
        ),
    )(h, h, adj_b, inv_deg, w_self, w_neigh, bias)


def prepare_sage_params(params):
    """One-time model setup: pad weights to [128,128] bf16 and bias to [1,128] f32.
    Hoisted out of the per-batch forward path."""
    prepared = []
    for (w_self, w_neigh, bias) in params:
        in_l, out_l = w_self.shape
        assert in_l <= LANE and out_l <= LANE, "feature dims must be <= 128"
        ws = jnp.zeros((LANE, LANE), jnp.float32).at[:in_l, :out_l].set(w_self)
        wn = jnp.zeros((LANE, LANE), jnp.float32).at[:in_l, :out_l].set(w_neigh)
        b = jnp.zeros((1, LANE), jnp.float32).at[0, :out_l].set(jnp.reshape(bias, (-1,)))
        prepared.append((ws.astype(jnp.bfloat16), wn.astype(jnp.bfloat16), b))
    return prepared


def sage_forward(blocks, x, prepared_params, n_hidden, *, tm_pref=256, tk_pref=512):
    """blocks: list of dense 0/1 adjacency matrices [num_dst_l, num_src_l]
               (DGL block convention: dst nodes == first num_dst src nodes).
       x     : [num_src_0, in_feats] raw (count) features.
       prepared_params: output of prepare_sage_params.
       Returns h of shape [num_dst_{L-1}, n_hidden] (f32)."""
    assert tm_pref % SUBLANE == 0 and tk_pref % LANE == 0
    n_layers = len(blocks)
    num_src0, in_feats = x.shape
    assert in_feats <= LANE

    # Per-layer dst tiling (monotone in num_dst, so dst_pad never grows with depth).
    dst_tiles = [_tile_and_pad(adj.shape[0], tm_pref) for adj in blocks]

    # Layer-0 src padding (must cover layer-0 dst rows; dst nodes are a prefix of src).
    src0 = max(_round_up(num_src0, SUBLANE), dst_tiles[0][1])
    if src0 > tk_pref:
        src0 = _round_up(src0, tk_pref)
    x_pad = jnp.zeros((src0, LANE), jnp.float32)
    x_pad = x_pad.at[:num_src0, :in_feats].set(x.astype(jnp.float32))

    h = x_pad
    for l, adj in enumerate(blocks):
        tm, dst_pad = dst_tiles[l]
        src_pad = h.shape[0]                    # for l>0: dst_pad of previous layer
        assert src_pad >= dst_pad
        tk = _pick_tk(src_pad, tk_pref)

        # Pad adjacency; exact f32 inverse degree on host (replaces in-kernel deg).
        a = jnp.zeros((dst_pad, src_pad), jnp.float32)
        a = a.at[:adj.shape[0], :adj.shape[1]].set(adj.astype(jnp.float32))
        deg = jnp.sum(a, axis=-1, keepdims=True)
        inv_deg = 1.0 / jnp.maximum(deg, 1.0)   # zero in-degree -> agg = 0 (DGL would error)
        adj_b = a.astype(jnp.bfloat16)          # 0/1 exact in bf16

        w_self, w_neigh, bias = prepared_params[l]
        last = (l == n_layers - 1)
        h = _sage_layer(h, adj_b, inv_deg, w_self, w_neigh, bias,
                        tm=tm, tk=tk,
                        apply_log=(l == 0),
                        apply_act_norm=(not last),
                        out_dtype=jnp.float32 if last else jnp.bfloat16)

    num_dst_last = blocks[-1].shape[0]
    return h[:num_dst_last, :n_hidden]


def sage_reference(blocks, x, params, n_hidden):
    """Pure-JAX f32 reference of the PyTorch forward (for correctness check)."""
    h = jnp.log(x + 1.0)
    n_layers = len(blocks)
    for l, (adj, (w_self, w_neigh, bias)) in enumerate(zip(blocks, params)):
        num_dst = adj.shape[0]
        deg = jnp.maximum(jnp.sum(adj, axis=-1, keepdims=True), 1.0)
        agg = (adj @ h) / deg
        h = h[:num_dst] @ w_self + agg @ w_neigh + bias
        if l < n_layers - 1:
            h = jnp.maximum(h, 0.0)
            ssq = jnp.sum(h * h, axis=-1, keepdims=True)
            h = h / jnp.sqrt(jnp.maximum(ssq, 1e-24))
    return h


def _glorot(key, shape):
    fan_in, fan_out = shape
    scale = jnp.sqrt(6.0 / (fan_in + fan_out))
    return jax.random.uniform(key, shape, jnp.float32, -scale, scale)


if __name__ == "__main__":
    # SAGE(in_feats=12, n_hidden=32, n_classes=8, n_layers=2,
    #      activation=relu, dropout=0.2, supervised=False, aggregator='mean')
    in_feats, n_hidden, n_layers = 12, 32, 2

    # Node counts per block (DGL NodeDataLoader-style shrinking frontier).
    num_src0, num_dst0 = 384, 96        # block 0: 384 src -> 96 dst
    num_src1, num_dst1 = 96, 32         # block 1:  96 src -> 32 dst

    key = jax.random.PRNGKey(0)
    k_x, k_a0, k_a1, k0s, k0n, k1s, k1n = jax.random.split(key, 7)

    # Raw count-like input features (non-negative).
    x = jnp.floor(jax.random.uniform(k_x, (num_src0, in_feats), jnp.float32) * 6.0)

    # Dense 0/1 block adjacencies (dst nodes == first num_dst src nodes).
    adj0 = (jax.random.uniform(k_a0, (num_dst0, num_src0)) < 0.10).astype(jnp.float32)
    adj1 = (jax.random.uniform(k_a1, (num_dst1, num_src1)) < 0.30).astype(jnp.float32)
    blocks = [adj0, adj1]

    # Deterministic SAGEConv parameters (W_self, W_neigh, bias) per layer.
    params = [
        (_glorot(k0s, (in_feats, n_hidden)),
         _glorot(k0n, (in_feats, n_hidden)),
         jnp.zeros((n_hidden,), jnp.float32)),
        (_glorot(k1s, (n_hidden, n_hidden)),
         _glorot(k1n, (n_hidden, n_hidden)),
         jnp.zeros((n_hidden,), jnp.float32)),
    ]

    prepared = prepare_sage_params(params)      # one-time (hoisted out of forward)

    # Small tiles here so the toy shapes actually exercise the (dst, src) grid:
    # layer 0 -> grid (2, 3), layer 1 -> grid (1, 1).
    h = sage_forward(blocks, x, prepared, n_hidden, tm_pref=64, tk_pref=128)
    h = jax.block_until_ready(h)

    assert h.shape == (num_dst1, n_hidden) and h.dtype == jnp.float32
    assert bool(jnp.all(jnp.isfinite(h)))

    h_ref = sage_reference(blocks, x, params, n_hidden)
    assert bool(jnp.allclose(h, h_ref, atol=5e-2, rtol=5e-2)), "mismatch vs f32 reference"

    print("KERNEL_OK")
</pallas_src>

<mosaic_0001>
module attributes {stable_mosaic.version = 11 : i64} {
  func.func @kernel(%arg0: i32, %arg1: i32, %arg2: memref<64x128xf32, #tpu.memory_space<vmem>>, %arg3: memref<128x128xf32, #tpu.memory_space<vmem>>, %arg4: memref<64x128xbf16, #tpu.memory_space<vmem>>, %arg5: memref<64x1xf32, #tpu.memory_space<vmem>>, %arg6: memref<128x128xbf16, #tpu.memory_space<vmem>>, %arg7: memref<128x128xbf16, #tpu.memory_space<vmem>>, %arg8: memref<1x128xf32, #tpu.memory_space<vmem>>, %arg9: memref<64x128xbf16, #tpu.memory_space<vmem>>, %arg10: memref<64x128xf32, #tpu.memory_space<vmem>>) attributes {dimension_semantics = [#tpu.dimension_semantics<parallel>, #tpu.dimension_semantics<arbitrary>], iteration_bounds = array<i64: 2, 3>, scalar_prefetch = 0 : i64, scratch_operands = 1 : i64, tpu.core_type = #tpu.core_type<tc>, window_params = [{transform_indices = @transform_0, window_bounds = array<i64: 64, 128>}, {transform_indices = @transform_1, window_bounds = array<i64: 128, 128>}, {transform_indices = @transform_2, window_bounds = array<i64: 64, 128>}, {transform_indices = @transform_3, window_bounds = array<i64: 64, 1>}, {pipeline_mode = #tpu.pipeline_mode<synchronous>, transform_indices = @transform_4, window_bounds = array<i64: 128, 128>}, {pipeline_mode = #tpu.pipeline_mode<synchronous>, transform_indices = @transform_5, window_bounds = array<i64: 128, 128>}, {pipeline_mode = #tpu.pipeline_mode<synchronous>, transform_indices = @transform_6, window_bounds = array<i64: 1, 128>}, {transform_indices = @transform_7, window_bounds = array<i64: 64, 128>}]} {
    %c0_i32 = arith.constant 0 : i32
    %0 = arith.cmpi eq, %arg1, %c0_i32 : i32
    %1 = arith.extui %0 : i1 to i32
    %c0_i32_0 = arith.constant 0 : i32
    %2 = arith.cmpi ne, %1, %c0_i32_0 : i32
    scf.if %2 {
      %cst_10 = arith.constant 0.000000e+00 : f32
      %16 = vector.broadcast %cst_10 : f32 to vector<64x128xf32>
      %c0_11 = arith.constant 0 : index
      %c0_12 = arith.constant 0 : index
      %17 = vector.load %arg10[%c0_11, %c0_12] : memref<64x128xf32, #tpu.memory_space<vmem>>, vector<64x128xf32>
      tpu.vector_store %arg10[%c0_11, %c0_12], %16 {strides = array<i32>} : memref<64x128xf32, #tpu.memory_space<vmem>>, vector<64x128xf32>,
    } else {
    }
    %c0 = arith.constant 0 : index
    %c0_1 = arith.constant 0 : index
    %3 = vector.load %arg3[%c0, %c0_1] : memref<128x128xf32, #tpu.memory_space<vmem>>, vector<128x128xf32>
    %cst = arith.constant 1.000000e+00 : f32
    %4 = vector.broadcast %cst : f32 to vector<128x128xf32>
    %5 = arith.addf %3, %4 : vector<128x128xf32>
    %6 = math.log %5 : vector<128x128xf32>
    %7 = arith.truncf %6 : vector<128x128xf32> to vector<128x128xbf16>
    %c0_2 = arith.constant 0 : index
    %c0_3 = arith.constant 0 : index
    %8 = vector.load %arg10[%c0_2, %c0_3] : memref<64x128xf32, #tpu.memory_space<vmem>>, vector<64x128xf32>
    %c0_4 = arith.constant 0 : index
    %c0_5 = arith.constant 0 : index
    %9 = vector.load %arg4[%c0_4, %c0_5] : memref<64x128xbf16, #tpu.memory_space<vmem>>, vector<64x128xbf16>
    %cst_6 = arith.constant dense<0.000000e+00> : vector<64x128xf32>
    %10 = tpu.matmul %9, %7, %cst_6 {dimension_numbers = #tpu.dot_dimension_numbers<[1], [0], [0], [1], [0, 0, 1, 1], [], []>} : vector<64x128xbf16>, vector<128x128xbf16>, vector<64x128xf32> -> vector<64x128xf32>
    %11 = arith.addf %8, %10 : vector<64x128xf32>
    %c0_7 = arith.constant 0 : index
    %c0_8 = arith.constant 0 : index
    %12 = vector.load %arg10[%c0_7, %c0_8] : memref<64x128xf32, #tpu.memory_space<vmem>>, vector<64x128xf32>
    tpu.vector_store %arg10[%c0_7, %c0_8], %11 {strides = array<i32>} : memref<64x128xf32, #tpu.memory_space<vmem>>, vector<64x128xf32>,
    %c2_i32 = arith.constant 2 : i32
    %13 = arith.cmpi eq, %arg1, %c2_i32 : i32
    %14 = arith.extui %13 : i1 to i32
    %c0_i32_9 = arith.constant 0 : i32
    %15 = arith.cmpi ne, %14, %c0_i32_9 : i32
    scf.if %15 {
      %c0_10 = arith.constant 0 : index
      %c0_11 = arith.constant 0 : index
      %16 = vector.load %arg10[%c0_10, %c0_11] : memref<64x128xf32, #tpu.memory_space<vmem>>, vector<64x128xf32>
      %c0_12 = arith.constant 0 : index
      %c0_13 = arith.constant 0 : index
      %17 = vector.load %arg5[%c0_12, %c0_13] : memref<64x1xf32, #tpu.memory_space<vmem>>, vector<64x1xf32>
      %18 = vector.broadcast %17 : vector<64x1xf32> to vector<64x128xf32>
      %19 = arith.mulf %16, %18 : vector<64x128xf32>
      %20 = arith.truncf %19 : vector<64x128xf32> to vector<64x128xbf16>
      %c0_14 = arith.constant 0 : index
      %c0_15 = arith.constant 0 : index
      %21 = vector.load %arg2[%c0_14, %c0_15] : memref<64x128xf32, #tpu.memory_space<vmem>>, vector<64x128xf32>
      %cst_16 = arith.constant 1.000000e+00 : f32
      %22 = vector.broadcast %cst_16 : f32 to vector<64x128xf32>
      %23 = arith.addf %21, %22 : vector<64x128xf32>
      %24 = math.log %23 : vector<64x128xf32>
      %25 = arith.truncf %24 : vector<64x128xf32> to vector<64x128xbf16>
      %c0_17 = arith.constant 0 : index
      %c0_18 = arith.constant 0 : index
      %26 = vector.load %arg6[%c0_17, %c0_18] : memref<128x128xbf16, #tpu.memory_space<vmem>>, vector<128x128xbf16>
      %cst_19 = arith.constant dense<0.000000e+00> : vector<64x128xf32>
      %27 = tpu.matmul %25, %26, %cst_19 {dimension_numbers = #tpu.dot_dimension_numbers<[1], [0], [0], [1], [0, 0, 1, 1], [], []>} : vector<64x128xbf16>, vector<128x128xbf16>, vector<64x128xf32> -> vector<64x128xf32>
      %c0_20 = arith.constant 0 : index
      %c0_21 = arith.constant 0 : index
      %28 = vector.load %arg7[%c0_20, %c0_21] : memref<128x128xbf16, #tpu.memory_space<vmem>>, vector<128x128xbf16>
      %cst_22 = arith.constant dense<0.000000e+00> : vector<64x128xf32>
      %29 = tpu.matmul %20, %28, %cst_22 {dimension_numbers = #tpu.dot_dimension_numbers<[1], [0], [0], [1], [0, 0, 1, 1], [], []>} : vector<64x128xbf16>, vector<128x128xbf16>, vector<64x128xf32> -> vector<64x128xf32>
      %30 = arith.addf %27, %29 : vector<64x128xf32>
      %c0_23 = arith.constant 0 : index
      %c0_24 = arith.constant 0 : index
      %31 = vector.load %arg8[%c0_23, %c0_24] : memref<1x128xf32, #tpu.memory_space<vmem>>, vector<1x128xf32>
      %32 = vector.broadcast %31 : vector<1x128xf32> to vector<64x128xf32>
      %33 = arith.addf %30, %32 : vector<64x128xf32>
      %cst_25 = arith.constant 0.000000e+00 : f32
      %34 = vector.broadcast %cst_25 : f32 to vector<64x128xf32>
      %35 = arith.maximumf %33, %34 : vector<64x128xf32>
      %36 = arith.mulf %35, %35 : vector<64x128xf32>
      %cst_26 = arith.constant dense<0.000000e+00> : vector<64xf32>
      %37 = vector.multi_reduction <add>, %36, %cst_26 [1] : vector<64x128xf32> to vector<64xf32>
      %38 = vector.shape_cast %37 : vector<64xf32> to vector<64x1xf32>
      %cst_27 = arith.constant 1.000000e-24 : f32
      %39 = vector.broadcast %cst_27 : f32 to vector<64x1xf32>
      %40 = arith.maximumf %38, %39 : vector<64x1xf32>
      %41 = math.rsqrt %40 : vector<64x1xf32>
      %42 = vector.broadcast %41 : vector<64x1xf32> to vector<64x128xf32>
      %43 = arith.mulf %35, %42 : vector<64x128xf32>
      %44 = arith.truncf %43 : vector<64x128xf32> to vector<64x128xbf16>
      %c0_28 = arith.constant 0 : index
      %c0_29 = arith.constant 0 : index
      %45 = vector.load %arg9[%c0_28, %c0_29] : memref<64x128xbf16, #tpu.memory_space<vmem>>, vector<64x128xbf16>
      tpu.vector_store %arg9[%c0_28, %c0_29], %44 {strides = array<i32>} : memref<64x128xbf16, #tpu.memory_space<vmem>>, vector<64x128xbf16>,
    } else {
    }
    return
  }
  func.func @transform_0(%arg0: i32, %arg1: i32) -> (i32, i32) {
    %c0_i32 = arith.constant 0 : i32
    %c0_i32_0 = arith.constant 0 : i32
    return %arg0, %c0_i32 : i32, i32
  }
  func.func @transform_1(%arg0: i32, %arg1: i32) -> (i32, i32) {
    %c0_i32 = arith.constant 0 : i32
    %c0_i32_0 = arith.constant 0 : i32
    return %arg1, %c0_i32 : i32, i32
  }
  func.func @transform_2(%arg0: i32, %arg1: i32) -> (i32, i32) {
    %c0_i32 = arith.constant 0 : i32
    return %arg0, %arg1 : i32, i32
  }
  func.func @transform_3(%arg0: i32, %arg1: i32) -> (i32, i32) {
    %c0_i32 = arith.constant 0 : i32
    %c0_i32_0 = arith.constant 0 : i32
    return %arg0, %c0_i32 : i32, i32
  }
  func.func @transform_4(%arg0: i32, %arg1: i32) -> (i32, i32) {
    %c0_i32 = arith.constant 0 : i32
    %c0_i32_0 = arith.constant 0 : i32
    %c0_i32_1 = arith.constant 0 : i32
    return %c0_i32, %c0_i32_0 : i32, i32
  }
  func.func @transform_5(%arg0: i32, %arg1: i32) -> (i32, i32) {
    %c0_i32 = arith.constant 0 : i32
    %c0_i32_0 = arith.constant 0 : i32
    %c0_i32_1 = arith.constant 0 : i32
    return %c0_i32, %c0_i32_0 : i32, i32
  }
  func.func @transform_6(%arg0: i32, %arg1: i32) -> (i32, i32) {
    %c0_i32 = arith.constant 0 : i32
    %c0_i32_0 = arith.constant 0 : i32
    %c0_i32_1 = arith.constant 0 : i32
    return %c0_i32, %c0_i32_0 : i32, i32
  }
  func.func @transform_7(%arg0: i32, %arg1: i32) -> (i32, i32) {
    %c0_i32 = arith.constant 0 : i32
    %c0_i32_0 = arith.constant 0 : i32
    return %arg0, %c0_i32 : i32, i32
  }
}

</mosaic_0001>

<bundles_post_ra>
// kernel: tpu_custom_call.1
= control target key start
LH: loop header
LB: loop body
LE: loop exit
PB: predicated region body
PF: predicated region fallthrough
CT: control target
= control target key end

     0   :  { %s2539_s0 = inlined_call_operand.hbm [shape: f32[384,128], index: 0, kind: input, shape index: {}]   ;;  %s2540_s1 = inlined_call_operand.hbm [shape: f32[384,128], index: 1, kind: input, shape index: {}]   ;;  %s2541_s2 = inlined_call_operand.hbm [shape: bf16[128,384], index: 2, kind: input, shape index: {}]   ;;  %s2542_s3 = inlined_call_operand.vmem [shape: f32[128,1], index: 3, kind: input, shape index: {}]   ;;  %s2543_s4 = inlined_call_operand.vmem [shape: bf16[128,128], index: 4, kind: input, shape index: {}]   ;;  %s2544_s5 = inlined_call_operand.vmem [shape: bf16[128,128], index: 5, kind: input, shape index: {}]   ;;  %s2545_s6 = inlined_call_operand.vmem [shape: f32[1,128], index: 6, kind: input, shape index: {}]   ;;  %s2546_s7 = inlined_call_operand.hbm [shape: bf16[128,128], index: 7, kind: output, shape index: {}]  }
   0x1   :  { %2564 = sst [smem:[#allocation22_spill]] %s2539_s0 }
   0x2   :  { %2565 = sst [smem:[#allocation23_spill]] %s2540_s1 }
   0x3   :  { %2566 = sst [smem:[#allocation24_spill]] %s2542_s3 }
   0x4   :  { %2567 = sst [smem:[#allocation25_spill]] %s2543_s4 }
   0x5   :  { %2568 = sst [smem:[#allocation26_spill]] %s2544_s5 }
   0x6   :  { %2569 = sst [smem:[#allocation27_spill]] %s2545_s6 }
   0x7   :  { %2570 = sst [smem:[#allocation28_spill]] %s2546_s7 }
   0x8   :  { %12 = vsyncpa [#allocation4], 0 }
   0x9   :  { %14 = vsyncpa [#allocation4 + $0x1], 0 }
   0xa   :  { %15 = vsyncpa [#allocation7], 0 }
   0xb   :  { %17 = vsyncpa [#allocation7 + $0x1], 0 }
   0xc   :  { %18 = vsyncpa [#allocation5], 0 }
   0xd   :  { %20 = vsyncpa [#allocation5 + $0x1], 0  ;;  %s2008_s24 = smov 0   ;;  %s2010_s25 = smov 0  }
   0xe   :  { %s2012_s26 = smov 0   ;;  %s2014_s27 = smov 0  }
   0xf   :  { %s2016_s28 = smov 0   ;;  %s2018_s29 = smov 0  }
  0x10   :  { %s2020_s30 = smov 0   ;;  %s2022_s8 = smov 0  }
  0x11   :  { %s2024_s9 = smov 0   ;;  %s2026_s10 = smov 0  }
  0x12   :  { %s2028_s11 = smov 0   ;;  %s2030_s12 = smov 0  }
  0x13   :  { %s2032_s13 = smov 0   ;;  %s2034_s14 = smov 0  }
  0x14 LB: > { %2571 = sst [smem:[#allocation14_spill]] %s1921_s29  ;;  %s2077_s15 = sadd.s32 4294967295, %s1953_s14   ;;  %s1953_s14 = sphi %s2034_s14, %s26_s14   ;;  %s1949_s13 = sphi %s2032_s13, %s2636_s13   ;;  %s1945_s12 = sphi %s2030_s12, %s2635_s12   ;;  %s1941_s11 = sphi %s2028_s11, %s2634_s11   ;;  %s1937_s10 = sphi %s2026_s10, %s2633_s10   ;;  %s1933_s9 = sphi %s2024_s9, %s2632_s9   ;;  %s1929_s8 = sphi %s2022_s8, %s2631_s8   ;;  %s1925_s30 = sphi %s2020_s30, %s2630_s30   ;;  %s1921_s29 = sphi %s2018_s29, %s2622_s29   ;;  %s1917_s28 = sphi %s2016_s28, %s2629_s28   ;;  %s1913_s27 = sphi %s2014_s27, %s2628_s27   ;;  %s1909_s26 = sphi %s2012_s26, %s2627_s26   ;;  %s1905_s25 = sphi %s2010_s25, %s2626_s25   ;;  %s1901_s24 = sphi %s2008_s24, %s2625_s24  }
  0x15   : > { %2572 = sst [smem:[#allocation15_spill]] %s1925_s30  ;;  %s35_s16 = sadd.s32 1, %s1945_s12 }
  0x16   : > { %2573 = sst [smem:[#allocation16_spill]] %s1937_s10  ;;  %p2080_p0 = scmp.ge.s32.totalorder %s35_s16, 3 }
  0x17   : > { %2574 = sst [smem:[#allocation17_spill]] %s1941_s11  ;;  %p2553_p1 = scmp.eq.s32.totalorder %s1953_s14, 0 }
  0x18   : > { %p2552_p2 = scmp.eq.s32.totalorder %s2077_s15, 0  ;;  %s71_s18 = sadd.s32 1, %s1921_s29 }
  0x19   : > { %s2638_s16 = smov (%p2080_p0, %s35_s16), 0  ;;  %p78_p3 = scmp.ne.s32.totalorder %s1921_s29, %s1917_s28 }
  0x1a   : > { %2576 = sst [smem:[#allocation18_spill]] %s2638_s16  ;;  %p84_p4 = scmp.ne.s32.totalorder %s1917_s28, %s1913_s27 }
  0x1b   : > { %s2096_s19 = ssub.s32 %s1945_s12, %s2638_s16  ;;  %p80_p6 = por %p78_p3, %p2553_p1 }
  0x1c   : > { %p69_p5 = scmp.eq.s32.totalorder %s2096_s19, 0  ;;  %p2103_p7 = por %p84_p4, %p2552_p2 }
  0x1d   : > { %p2551_p8 = scmp.lt.s32.totalorder %s1953_s14, 6  ;;  %s281_s22 = sand.u32 1, %s1953_s14  }
  0x1e   : > { %s2577_s20 = scalar_select %p2103_p7, 1, 0 }
  0x1f   : > { %s2109_s21 = scalar_select %p69_p5, %s1921_s29, %s71_s18  }
  0x20   : > { %2578 = sst [smem:[#allocation19_spill]] %s2577_s20  ;;  %s283_s23 = sand.u32 1, %s1921_s29  }
  0x21   : > { %2579 = sst [smem:[#allocation20_spill]] %s2109_s21  ;;  %s1261_s7 = sshll.u32 %s283_s23, 7 }
  0x22   : > { %s1312_s27 = sshll.u32 %s1945_s12, 11  ;;  %s2580_s1 = sld [smem:[#allocation23_spill]] }
  0x23   : > { %s285_s4 = scalar_lea.vmem [#allocation6], %s1261_s7  ;;  %p2123_p9 = pnand %p2551_p8, %p80_p6 }
  0x24   : > { %s292_s10 = sshll.u32 %s285_s4, 4  ;;  %s2129_s6 = scalar_lea.sflag [#allocation7], %s281_s22  ;;  %s2119_s10 = int_to_ptr.vmem [resolvable:$true] %s292_s10 }
  0x25   : > { %p1711_p13 = pneg %p2123_p9 }
  0x28   : > { %s2117_s5 = scalar_lea.hbm %s2580_s1, %s1312_s27  ;;  %s1714_s23 = scalar_lea.hbm %s2580_s1, 6144 }
  0x29   : > { %s1709_s16 = scalar_lea.hbm %s2117_s5, 2048  ;;  %p1715_p5 = scmp.lt.u32.totalorder %s2117_s5, %s2580_s1 }
  0x2a   : > { %p1710_p12 = scmp.ne.s32.totalorder %s2117_s5, %s1709_s16  ;;  %p1716_p6 = scmp.lt.u32.totalorder %s1714_s23, %s1709_s16 }
  0x2b   : > { %p1718_p2 = scmp.lt.u32.totalorder %s1709_s16, %s2117_s5 }
  0x2c   : > { %p1712_p3 = pnand %p1711_p13, %p1710_p12  ;;  %p1717_p8 = por %p1716_p6, %p1715_p5 }
  0x2e   : > { %p1713_p4 = pneg %p1712_p3  ;;  %p1719_p1 = por %p1718_p2, %p1717_p8 }
  0x30   : > { %p1720_p10 = pnand %p1719_p1, %p1713_p4 }
  0x32   : > { %1723 = shalt.err (!%p1720_p10)
}
  0x33   : > { %s1724_s22 = scalar_lea.vmem %s2119_s10, 2048  ;;  %s1955_s4 = smov [#allocation6]  }
  0x34   : > { %p1725_p12 = scmp.ne.s32.totalorder %s2119_s10, %s1724_s22  ;;  %s1729_s7 = sshll.u32 %s1955_s4, 4  ;;  %s1730_s7 = int_to_ptr.vmem [resolvable:$false] %s1729_s7 }
  0x35   : > { %s1731_s21 = scalar_lea.vmem %s1730_s7, 4096  ;;  %p1732_p7 = scmp.lt.s32.totalorder %s2119_s10, %s1730_s7 }
  0x36   : > { %p1727_p3 = pnand %p1725_p12, %p1711_p13  ;;  %p1733_p5 = scmp.lt.s32.totalorder %s1731_s21, %s1724_s22 }
  0x38   : > { %p1728_p11 = pneg %p1727_p3  ;;  %p1734_p6 = por %p1733_p5, %p1732_p7 }
  0x3a   : > { %p1735_p2 = pnand %p1734_p6, %p1728_p11 }
  0x3c   : > { %1738 = shalt.err (!%p1735_p2)
}
  0x3d   : > { %s2555_s16 = smov 128   ;;  %s2556_s23 = smov 8  }
  0x3e   : > { %1492 = dma.hbm_to_vmem [thread:$0]  (!%p2123_p9), %s2117_s5, 2048, %s2119_s10, %s2129_s6, %s2555_s16, %s2555_s16, %s2556_s23  }
  0x3f   : > { %p2582_p1 = scmp.lt.s32.totalorder %s1953_s14, 7  ;;  %p2583_p7 = scmp.ge.s32.totalorder %s1953_s14, 1 }
  0x40   : > { %s1255_s22 = sadd.s32 4294967294, %s1953_s14   ;;  %s38_s4 = sadd.s32 1, %s1949_s13 }
  0x41   : > { %p2164_p8 = pnand %p2583_p7, %p2582_p1  ;;  %s2640_s4 = smov (!%p2080_p0, %s38_s4), %s1949_s13 }
  0x42   : > { %s45_s7 = sadd.s32 1, %s1933_s9  ;;  %p52_p10 = scmp.ne.s32.totalorder %s1933_s9, %s1929_s8 }
  0x43   : > { %s2584_s27 = scalar_select %p2164_p8, 1, 0 }
  0x44   : > { %p40_p11 = scmp.ge.s32.totalorder %s2640_s4, 2  ;;  %p58_p13 = scmp.ne.s32.totalorder %s1929_s8, %s1925_s30 }
  0x45   : > { %p2585_p4 = scmp.eq.s32.totalorder %s1953_s14, 0  ;;  %p225_p12 = scmp.eq.s32.totalorder %s2077_s15, 5 }
  0x46   : > { %s2642_s4 = smov (%p40_p11, %s2640_s4), 0  ;;  %p2588_p3 = scmp.eq.s32.totalorder %s2077_s15, 0 }
  0x47   : > { %p2180_p9 = por %p2585_p4, %p52_p10  ;;  %2587 = sst [smem:[#allocation21_spill]] %s2642_s4 }
  0x48   : > { %p2189_p0 = por %p2588_p3, %p58_p13  ;;  %p2193_p5 = por %p225_p12, %p52_p10 }
  0x49   : > { %s42_s18 = ssub.s32 %s1949_s13, %s2642_s4  ;;  %p231_p6 = scmp.eq.s32.totalorder %s1255_s22, 5 }
  0x4a   : > { %s2589_s10 = scalar_select %p2189_p0, 1, 0 }
  0x4b   : > { %s2590_s17 = scalar_select %p2193_p5, 1, 0 }
  0x4c   : > { %p43_p2 = scmp.eq.s32.totalorder %s42_s18, 0  ;;  %s96_s21 = sor.u32 %s2096_s19, %s42_s18 }
  0x4d   : > { %p2200_p1 = scmp.eq.s32.totalorder %s96_s21, 0  ;;  %p2204_p7 = por %p231_p6, %p58_p13 }
  0x4e   : > { %s2209_s1 = scalar_select %p43_p2, %s1933_s9, %s45_s7  }
  0x4f   : > { %s2592_s23 = scalar_select %p2204_p7, 1, 0 }
  0x50   : > { %s260_s29 = sand.u32 1, %s1933_s9   ;;  %s1311_s30 = sshll.u32 %s1949_s13, 10 }
  0x51   : > { %s1258_s3 = sshll.u32 %s260_s29, 6  ;;  %s2593_s0 = sld [smem:[#allocation22_spill]] }
  0x52   : > { %s264_s19 = scalar_lea.vmem [#allocation3], %s1258_s3  ;;  %p2594_p10 = scmp.lt.s32.totalorder %s1953_s14, 6 }
  0x53   : > { %s271_s22 = sshll.u32 %s264_s19, 4  ;;  %s2228_s7 = scalar_lea.sflag [#allocation4], %s260_s29  ;;  %s2226_s22 = int_to_ptr.vmem [resolvable:$true] %s271_s22 }
  0x54   : > { %p2222_p11 = pnand %p2594_p10, %p2180_p9 }
  0x56   : > { %p1741_p4 = pneg %p2222_p11 }
  0x57   : > { %s2216_s4 = scalar_lea.hbm %s2593_s0, %s1311_s30  ;;  %s1744_s20 = scalar_lea.hbm %s2593_s0, 6144 }
  0x58   : > { %s1739_s30 = scalar_lea.hbm %s2216_s4, 1024  ;;  %p1745_p9 = scmp.lt.u32.totalorder %s2216_s4, %s2593_s0 }
  0x59   : > { %p1740_p13 = scmp.ne.s32.totalorder %s2216_s4, %s1739_s30  ;;  %p1746_p6 = scmp.lt.u32.totalorder %s1744_s20, %s1739_s30 }
  0x5a   : > { %p1748_p10 = scmp.lt.u32.totalorder %s1739_s30, %s2216_s4 }
  0x5b   : > { %p1742_p12 = pnand %p1741_p4, %p1740_p13  ;;  %p1747_p2 = por %p1746_p6, %p1745_p9 }
  0x5d   : > { %p1743_p3 = pneg %p1742_p12  ;;  %p1749_p7 = por %p1748_p10, %p1747_p2 }
  0x5f   : > { %p1750_p5 = pnand %p1749_p7, %p1743_p3 }
  0x61   : > { %1753 = shalt.err (!%p1750_p5)
}
  0x62   : > { %s1754_s29 = scalar_lea.vmem %s2226_s22, 1024  ;;  %s1958_s19 = smov [#allocation3]  }
  0x63   : > { %p1755_p13 = scmp.ne.s32.totalorder %s2226_s22, %s1754_s29  ;;  %s1759_s3 = sshll.u32 %s1958_s19, 4  ;;  %s1760_s3 = int_to_ptr.vmem [resolvable:$false] %s1759_s3 }
  0x64   : > { %s1761_s11 = scalar_lea.vmem %s1760_s3, 2048  ;;  %p1762_p8 = scmp.lt.s32.totalorder %s2226_s22, %s1760_s3 }
  0x65   : > { %p1757_p12 = pnand %p1755_p13, %p1741_p4  ;;  %p1763_p9 = scmp.lt.s32.totalorder %s1761_s11, %s1754_s29 }
  0x67   : > { %p1758_p0 = pneg %p1757_p12  ;;  %p1764_p6 = por %p1763_p9, %p1762_p8 }
  0x69   : > { %p1765_p2 = pnand %p1764_p6, %p1758_p0 }
  0x6b   : > { %1768 = shalt.err (!%p1765_p2)
}
  0x6c   : > { %s2596_s30 = smov 8   ;;  %s2597_s20 = smov 128  }
  0x6d   : > { %1489 = dma.hbm_to_vmem [thread:$0]  (!%p2222_p11), %s2216_s4, 1024, %s2226_s22, %s2228_s7, %s2597_s20, %s2597_s20, %s2596_s30  }
  0x6e   : > { %s99_s18 = sadd.s32 1, %s1909_s26  ;;  %p106_p8 = scmp.ne.s32.totalorder %s1909_s26, %s1905_s25 }
  0x6f   : > { %s2265_s5 = scalar_select %p2200_p1, %s1909_s26, %s99_s18  }
  0x70   : > { %p2598_p0 = scmp.eq.s32.totalorder %s1953_s14, 0  ;;  %p112_p7 = scmp.ne.s32.totalorder %s1905_s25, %s1901_s24 }
  0x71   : > { %s304_s21 = sand.u32 1, %s1909_s26   ;;  %s1477_s29 = smul.u32 24, %s1949_s13 }
  0x72   : > { %p108_p5 = por %p106_p8, %p2598_p0  ;;  %p2599_p4 = scmp.eq.s32.totalorder %s2077_s15, 0 }
  0x73   : > { %s1264_s3 = sshll.u32 %s304_s21, 5  ;;  %s312_s11 = sadd.s32 %s1945_s12, %s1477_s29 }
  0x74   : > { %p2275_p3 = por %p112_p7, %p2599_p4  ;;  %s1267_s0 = sshll.u32 %s312_s11, 6 }
  0x75   : > { %s306_s4 = scalar_lea.vmem [#allocation8], %s1264_s3  ;;  %s2283_s16 = scalar_lea.hbm %s2541_s2, %s1267_s0 }
  0x76   : > { %s315_s22 = sshll.u32 %s306_s4, 4  ;;  %p2601_p1 = scmp.lt.s32.totalorder %s1953_s14, 6  ;;  %s2285_s22 = int_to_ptr.vmem [resolvable:$true] %s315_s22 }
  0x77   : > { %s1769_s20 = scalar_lea.hbm %s2283_s16, 512  ;;  %s1774_s21 = scalar_lea.hbm %s2541_s2, 3072 }
  0x78   : > { %p2289_p11 = pnand %p2601_p1, %p108_p5  ;;  %p1770_p10 = scmp.ne.s32.totalorder %s2283_s16, %s1769_s20 }
  0x79   : > { %p1775_p6 = scmp.lt.u32.totalorder %s2283_s16, %s2541_s2  ;;  %p1776_p2 = scmp.lt.u32.totalorder %s1774_s21, %s1769_s20 }
  0x7a   : > { %p1771_p13 = pneg %p2289_p11  ;;  %p1778_p0 = scmp.lt.u32.totalorder %s1769_s20, %s2283_s16 }
  0x7b   : > { %p1777_p8 = por %p1776_p2, %p1775_p6 }
  0x7c   : > { %p1772_p12 = pnand %p1771_p13, %p1770_p10 }
  0x7d   : > { %p1779_p5 = por %p1778_p0, %p1777_p8 }
  0x7e   : > { %p1773_p9 = pneg %p1772_p12 }
  0x80   : > { %p1780_p7 = pnand %p1779_p5, %p1773_p9 }
  0x82   : > { %1783 = shalt.err (!%p1780_p7)
}
  0x83   : > { %s1784_s11 = scalar_lea.vmem %s2285_s22, 512  ;;  %s1959_s4 = smov [#allocation8]  }
  0x84   : > { %p1785_p4 = scmp.ne.s32.totalorder %s2285_s22, %s1784_s11  ;;  %s1789_s7 = sshll.u32 %s1959_s4, 4  ;;  %s1790_s7 = int_to_ptr.vmem [resolvable:$false] %s1789_s7 }
  0x85   : > { %s1791_s30 = scalar_lea.vmem %s1790_s7, 1024  ;;  %p1792_p12 = scmp.lt.s32.totalorder %s2285_s22, %s1790_s7 }
  0x86   : > { %p1787_p1 = pnand %p1785_p4, %p1771_p13  ;;  %p1793_p6 = scmp.lt.s32.totalorder %s1791_s30, %s1784_s11 }
  0x88   : > { %p1788_p10 = pneg %p1787_p1  ;;  %p1794_p2 = por %p1793_p6, %p1792_p12 }
  0x8a   : > { %p1795_p8 = pnand %p1794_p2, %p1788_p10 }
  0x8c   : > { %1798 = shalt.err (!%p1795_p8)
}
  0x8d   : > { %s1960_s20 = smov 192   ;;  %s1961_s0 = smov 64  }
  0x8e   : > { %s1962_s18 = smov 4   ;;  %p2603_p13 = scmp.ne.s32.totalorder %s2584_s27, 0 }
  0x8f   : > { %1495 = dma.hbm_to_vmem [thread:$0]  (!%p2289_p11), %s2283_s16, 512, %s2285_s22, %s2129_s6, %s1960_s20, %s1961_s0, %s1962_s18  }
  0x90   : > { %336 = sbr.rel (%p2603_p13) target bundleno = 887 (0x377), region = 48  ;;  %s2322_s21 = sand.u32 (!%p2603_p13), 1, %s1929_s8  }
  0x91   : > { %s1269_s29 = sshll.u32 (!%p2603_p13), %s2322_s21, 6  ;;  %s339_s3 = scalar_lea.sflag (!%p2603_p13), [#allocation4], %s2322_s21 }
  0x92   : > { %s2326_s11 = scalar_lea.vmem (!%p2603_p13), [#allocation3], %s1269_s29  ;;  %p2604_p9 = scmp.ne.s32.totalorder (!%p2603_p13), %s2589_s10, 0 }
  0x97   : > { %1884 = dma.done.wait (%p2604_p9), %s339_s3, 1024  }
  0x98   : > { %1886 = vsyncadd (%p2604_p9), %s339_s3, 4294966272  ;;  %s2605_s6 = sld [smem:[#allocation19_spill]]  ;;  %s347_s27 = sand.u32 1, %s2077_s15  }
  0x99   : > { %s349_s22 = sand.u32 1, %s1917_s28   ;;  %s348_s24 = scalar_lea.sflag [#allocation7], %s347_s27 }
  0x9a   : > { %s1270_s16 = sshll.u32 %s349_s22, 7 }
  0x9b   : > { %s2334_s4 = scalar_lea.vmem [#allocation6], %s1270_s16 }
  0x9e   : > { %p2606_p11 = scmp.ne.s32.totalorder %s2605_s6, 0 }
  0xa0   : > { %1888 = dma.done.wait (%p2606_p11), %s348_s24, 2048  }
  0xa1   : > { %1890 = vsyncadd (%p2606_p11), %s348_s24, 4294965248  ;;  %s358_s7 = sand.u32 1, %s1905_s25  }
  0xa2   : > { %s1271_s30 = sshll.u32 %s358_s7, 5 }
  0xa3   : > { %s2341_s10 = scalar_lea.vmem [#allocation8], %s1271_s30 }
  0xa4   : > { %1892 = dma.done.wait (%p2275_p3), %s348_s24, 512  }
  0xa5   : > { %1894 = vsyncadd (%p2275_p3), %s348_s24, 4294966784  ;;  %s2607_s15 = sld [smem:[#allocation17_spill]]  ;;  %s1272_s20 = sshll.u32 %s2322_s21, 5 }
  0xa6   : > { %s2608_s6 = sld [smem:[#allocation24_spill]]  ;;  %s2354_s22 = scalar_lea.vmem [#allocation9], %s1272_s20 }
  0xa7   : > { %s2609_s16 = sld [smem:[#allocation16_spill]] }
  0xab   : > { %s1273_s0 = sshll.u32 %s2607_s15, 3 }
  0xac   : > { %p410_p0 = scmp.lt.s32.totalorder %s1273_s0, 15 }
  0xad   : > { %p1275_p5 = scmp.ne.s32.totalorder %s2609_s16, 0 }
  0xae   : > { %s2644_s0 = smov (!%p410_p0, %s1273_s0), 15  ;;  %v1963_v0 = vmov (!%p1275_p5), 0.0  }
  0xaf   : > { %s1274_s18 = sshll.u32 %s2644_s0, 3  ;;  %420 = sbr.rel (%p1275_p5) target bundleno = 182 (0xb6), region = 64  ;;  %421 = vst [vmem:[#allocation2] sm:$0xff] (!%p1275_p5), %v1963_v0  ;;  %422 = vst [vmem:[#allocation2 + $0x8] sm:$0xff] (!%p1275_p5), %v1963_v0 }
  0xb0   : > { %s2352_s27 = scalar_lea.vmem %s2608_s6, %s1274_s18  ;;  %423 = vst [vmem:[#allocation2 + $0x10] sm:$0xff] (!%p1275_p5), %v1963_v0  ;;  %424 = vst [vmem:[#allocation2 + $0x18] sm:$0xff] (!%p1275_p5), %v1963_v0 }
  0xb1   : > { %425 = vst [vmem:[#allocation2 + $0x20] sm:$0xff] (!%p1275_p5), %v1963_v0  ;;  %426 = vst [vmem:[#allocation2 + $0x28] sm:$0xff] (!%p1275_p5), %v1963_v0 }
  0xb2   : > { %427 = vst [vmem:[#allocation2 + $0x30] sm:$0xff] (!%p1275_p5), %v1963_v0  ;;  %428 = vst [vmem:[#allocation2 + $0x38] sm:$0xff] (!%p1275_p5), %v1963_v0 }
  0xb6 PF: > { %v429_v1 = vld [vmem:[%s2334_s4] sm:$0xff]  ;;  %v430_v2 = vld [vmem:[%s2334_s4 + $0x8] sm:$0xff]  ;;  %v431_v3 = vld [vmem:[%s2334_s4 + $0x10] sm:$0xff]  ;;  %s2610_s19 = sld [smem:[#allocation16_spill]] }
  0xb7   : > { %v445_v4 = vadd.f32 1.0, %v429_v1  ;;  %v446_v5 = vadd.f32 1.0, %v430_v2  ;;  %v432_v6 = vld [vmem:[%s2334_s4 + $0x18] sm:$0xff]  ;;  %v447_v7 = vadd.f32 1.0, %v431_v3  ;;  %v433_v8 = vld [vmem:[%s2334_s4 + $0x20] sm:$0xff]  ;;  %v434_v9 = vld [vmem:[%s2334_s4 + $0x28] sm:$0xff] }
  0xb8   : > { %v448_v10 = vadd.f32 1.0, %v432_v6  ;;  %v435_v11 = vld [vmem:[%s2334_s4 + $0x30] sm:$0xff]  ;;  %v449_v12 = vadd.f32 1.0, %v433_v8  ;;  %v436_v13 = vld [vmem:[%s2334_s4 + $0x38] sm:$0xff]  ;;  %v450_v14 = vadd.f32 1.0, %v434_v9  ;;  %v437_v15 = vld [vmem:[%s2334_s4 + $0x40] sm:$0xff] }
  0xb9   : > { %1627 = vlog2.f32 %v445_v4  ;;  %v451_v16 = vadd.f32 1.0, %v435_v11  ;;  %v438_v17 = vld [vmem:[%s2334_s4 + $0x48] sm:$0xff]  ;;  %v452_v18 = vadd.f32 1.0, %v436_v13  ;;  %v1623_v19 = vld [vmem:[%s2341_s10] sm:$0xff]   ;;  %v453_v20 = vadd.f32 1.0, %v437_v15  ;;  %v1624_v21 = vld [vmem:[%s2341_s10 + $0x10] sm:$0xff]  }
  0xba   : > { %1629 = vlog2.f32 %v446_v5  ;;  %v454_v22 = vadd.f32 1.0, %v438_v17  ;;  %v439_v23 = vld [vmem:[%s2334_s4 + $0x50] sm:$0xff]  ;;  %1397 = vmatprep.mubr.bf16.mxu0 %v1623_v19  ;;  %v440_v24 = vld [vmem:[%s2334_s4 + $0x58] sm:$0xff]  ;;  %1401 = vmatprep.mubr.bf16.mxu1 %v1624_v21  ;;  %v441_v27 = vld [vmem:[%s2334_s4 + $0x60] sm:$0xff] }
  0xbb   : > { %1631 = vlog2.f32 %v447_v7  ;;  %v455_v25 = vadd.f32 1.0, %v439_v23  ;;  %v456_v26 = vadd.f32 1.0, %v440_v24  ;;  %v442_v29 = vld [vmem:[%s2334_s4 + $0x68] sm:$0xff]  ;;  %v457_v34 = vadd.f32 1.0, %v441_v27  ;;  %v443_v38 = vld [vmem:[%s2334_s4 + $0x70] sm:$0xff]  ;;  %v444_v42 = vld [vmem:[%s2334_s4 + $0x78] sm:$0xff] }
  0xbc   : > { %1633 = vlog2.f32 %v448_v10  ;;  %v458_v37 = vadd.f32 1.0, %v442_v29  ;;  %v459_v48 = vadd.f32 1.0, %v443_v38  ;;  %v460_v50 = vadd.f32 1.0, %v444_v42  ;;  %v1625_v11 = vld [vmem:[%s2341_s10 + $0x8] sm:$0xff]   ;;  %v503_v13 = vld [vmem:[#allocation2 + $0x10] sm:$0xff]  ;;  %v501_v15 = vld [vmem:[#allocation2] sm:$0xff] }
  0xbd   : > { %1635 = vlog2.f32 %v449_v12  ;;  %v1626_v12 = vld [vmem:[%s2341_s10 + $0x18] sm:$0xff]   ;;  %p1280_p3 = scmp.ne.s32.totalorder %s2610_s19, 2 }
  0xbe   : > { %1637 = vlog2.f32 %v450_v14  ;;  %v507_v14 = vld [vmem:[#allocation2 + $0x30] sm:$0xff]  ;;  %v504_v19 = vld [vmem:[#allocation2 + $0x18] sm:$0xff]  ;;  %v634_v38 = vld [vmem:[%s2352_s27] sm:$0xff] (!%p1280_p3)  ;;  %s2611_s7 = sld [smem:[#allocation25_spill]] (!%p1280_p3)  ;;  %s2612_s15 = sld [smem:[#allocation26_spill]] (!%p1280_p3) }
  0xbf   : > { %1639 = vlog2.f32 %v451_v16  ;;  %v505_v16 = vld [vmem:[#allocation2 + $0x20] sm:$0xff]  ;;  %s2613_s29 = sld [smem:[#allocation27_spill]] (!%p1280_p3) }
  0xc0   : > { %1641 = vlog2.f32 %v452_v18 }
  0xc1   : > { %1643 = vlog2.f32 %v453_v20  ;;  %v508_v20 = vld [vmem:[#allocation2 + $0x38] sm:$0xff] }
  0xc2   : > { %1645 = vlog2.f32 %v454_v22 }
  0xc3   : > { %v1628_v28 = vpop.eup %1627  ;;  %1647 = vlog2.f32 %v455_v25  ;;  %v502_v25 = vld [vmem:[#allocation2 + $0x8] sm:$0xff] }
  0xc4   : > { %v1630_v30 = vpop.eup %1629  ;;  %v462_v31 = vmul.f32 0.6931472, %v1628_v28  ;;  %1649 = vlog2.f32 %v456_v26  ;;  %v506_v26 = vld [vmem:[#allocation2 + $0x28] sm:$0xff]  ;;  %v1661_v42 = vld [vmem:[%s2611_s7] sm:$0xff] (!%p1280_p3)  }
  0xc5   : > { %v1632_v32 = vpop.eup %1631  ;;  %v464_v33 = vmul.f32 0.6931472, %v1630_v30  ;;  %1651 = vlog2.f32 %v457_v34 }
  0xc6   : > { %v1634_v35 = vpop.eup %1633  ;;  %v466_v36 = vmul.f32 0.6931472, %v1632_v32  ;;  %1653 = vlog2.f32 %v458_v37  ;;  %v636_v37 = vld [vmem:[%s2352_s27 + $0x10] sm:$0xff] (!%p1280_p3) }
  0xc7   : > { %v1636_v39 = vpop.eup %1635  ;;  %v493_v40 = vpack.c.bf16 %v464_v33, %v462_v31  ;;  %v468_v41 = vmul.f32 0.6931472, %v1634_v35  ;;  %1655 = vlog2.f32 %v459_v48  ;;  %v1665_v48 = vld [vmem:[%s2611_s7 + $0x10] sm:$0xff] (!%p1280_p3)  }
  0xc8   : > { %v1638_v43 = vpop.eup %1637  ;;  %v470_v44 = vmul.f32 0.6931472, %v1636_v39  ;;  %1657 = vlog2.f32 %v460_v50  ;;  %v1964_v39 = vmov (!%p1280_p3), 0   ;;  %v641_v50 = vld [vmem:[%s2352_s27 + $0x38] sm:$0xff] (!%p1280_p3) }
  0xc9   : > { %v1640_v45 = vpop.eup %1639  ;;  %1381 = vmatprep.subr.bf16.mxu0 %v493_v40  ;;  %1453 = vmatprep.subr.bf16.mxu1 %v493_v40  ;;  %v494_v46 = vpack.c.bf16 %v468_v41, %v466_v36  ;;  %v472_v47 = vmul.f32 0.6931472, %v1638_v43  ;;  %v635_v41 = vld [vmem:[%s2352_s27 + $0x8] sm:$0xff] (!%p1280_p3)  ;;  %v1662_v43 = vld [vmem:[%s2612_s15] sm:$0xff] (!%p1280_p3)  }
  0xca   : > { %v1642_v49 = vpop.eup %1641  ;;  %1382 = vmatpush3.bf16.msra.mxu0 %v493_v40  ;;  %1461 = vmatpush3.bf16.msra.mxu1 %v493_v40  ;;  %v474_v53 = vmul.f32 0.6931472, %v1640_v45  ;;  %v637_v40 = vld [vmem:[%s2352_s27 + $0x18] sm:$0xff] (!%p1280_p3)  ;;  %v1663_v45 = vld [vmem:[%s2611_s7 + $0x8] sm:$0xff] (!%p1280_p3)  }
  0xcb   : > { %v1644_v51 = vpop.eup %1643  ;;  %1383 = vmatprep.subr.bf16.mxu0 %v494_v46  ;;  %1454 = vmatprep.subr.bf16.mxu1 %v494_v46  ;;  %v495_v52 = vpack.c.bf16 %v472_v47, %v470_v44  ;;  %v476_v54 = vmul.f32 0.6931472, %v1642_v49  ;;  %v639_v44 = vld [vmem:[%s2352_s27 + $0x28] sm:$0xff] (!%p1280_p3)  ;;  %v638_v47 = vld [vmem:[%s2352_s27 + $0x20] sm:$0xff] (!%p1280_p3)  ;;  %v1666_v49 = vld [vmem:[%s2612_s15 + $0x10] sm:$0xff] (!%p1280_p3)  }
  0xcc   : > { %v1646_v55 = vpop.eup %1645  ;;  %v478_v58 = vmul.f32 0.6931472, %v1644_v51  ;;  %1660 = vset.pattern.permute.xlu1 (!%p1280_p3), %v1964_v39  ;;  %1659 = vset.pattern.permute.xlu0 (!%p1280_p3), %v1964_v39  ;;  %v640_v51 = vld [vmem:[%s2352_s27 + $0x30] sm:$0xff] (!%p1280_p3) }
  0xcd   : > { %v1648_v56 = vpop.eup %1647  ;;  %v496_v57 = vpack.c.bf16 %v476_v54, %v474_v53  ;;  %v480_v59 = vmul.f32 0.6931472, %v1646_v55  ;;  %654 = vperm.xlu1 (!%p1280_p3), %1660, %v636_v37   ;;  %644 = vperm.xlu0 (!%p1280_p3), %1659, %v634_v38   ;;  %v1668_v53 = vld [vmem:[%s2612_s15 + $0x18] sm:$0xff] (!%p1280_p3)   ;;  %v1669_v54 = vld [vmem:[%s2611_s7 + $0x20] sm:$0xff] (!%p1280_p3)  }
  0xce   : > { %1384 = vmatpush3.bf16.msra.mxu0 %v494_v46  ;;  %1462 = vmatpush3.bf16.msra.mxu1 %v494_v46  ;;  %v1650_v60 = vpop.eup %1649  ;;  %v482_v63 = vmul.f32 0.6931472, %v1648_v56  ;;  %v1664_v46 = vld [vmem:[%s2612_s15 + $0x8] sm:$0xff] (!%p1280_p3)   ;;  %v1670_v55 = vld [vmem:[%s2612_s15 + $0x20] sm:$0xff] (!%p1280_p3)  }
  0xcf   : > { %1385 = vmatprep.subr.bf16.mxu0 %v495_v52  ;;  %1455 = vmatprep.subr.bf16.mxu1 %v495_v52  ;;  %v1652_v61 = vpop.eup %1651  ;;  %v497_v62 = vpack.c.bf16 %v480_v59, %v478_v58  ;;  %v484_v0 = vmul.f32 0.6931472, %v1650_v60  ;;  %v1671_v56 = vld [vmem:[%s2611_s7 + $0x28] sm:$0xff] (!%p1280_p3)   ;;  %v696_v59 = vld [vmem:[%s2326_s11 + $0x10] sm:$0xff] (!%p1280_p3) }
  0xd0   : > { %v1654_v1 = vpop.eup %1653  ;;  %v486_v4 = vmul.f32 0.6931472, %v1652_v61  ;;  %v695_v58 = vld [vmem:[%s2326_s11 + $0x8] sm:$0xff] (!%p1280_p3) }
  0xd1   : > { %v1656_v2 = vpop.eup %1655  ;;  %v498_v3 = vpack.c.bf16 %v484_v0, %v482_v63  ;;  %v488_v5 = vmul.f32 0.6931472, %v1654_v1  ;;  %659 = vperm.xlu1 (!%p1280_p3), %1660, %v637_v40   ;;  %649 = vperm.xlu0 (!%p1280_p3), %1659, %v635_v41   ;;  %v1672_v60 = vld [vmem:[%s2612_s15 + $0x28] sm:$0xff] (!%p1280_p3)   ;;  %v697_v63 = vld [vmem:[%s2326_s11 + $0x18] sm:$0xff] (!%p1280_p3)  ;;  %v704_v0 = vadd.f32 (!%p1280_p3), 1.0, %v696_v59 }
  0xd2   : > { %1386 = vmatpush3.bf16.msra.mxu0 %v495_v52  ;;  %1463 = vmatpush3.bf16.msra.mxu1 %v495_v52  ;;  %v1658_v6 = vpop.eup %1657  ;;  %v490_v8 = vmul.f32 0.6931472, %v1656_v2  ;;  %v1667_v52 = vld [vmem:[%s2611_s7 + $0x18] sm:$0xff] (!%p1280_p3)   ;;  %v705_v1 = vadd.f32 (!%p1280_p3), 1.0, %v697_v63  ;;  %v698_v2 = vld [vmem:[%s2326_s11 + $0x20] sm:$0xff] (!%p1280_p3) }
  0xd3   : > { %1387 = vmatprep.subr.bf16.mxu0 %v496_v57  ;;  %1456 = vmatprep.subr.bf16.mxu1 %v496_v57  ;;  %v499_v7 = vpack.c.bf16 %v488_v5, %v486_v4  ;;  %v492_v9 = vmul.f32 0.6931472, %v1658_v6  ;;  %v706_v4 = vadd.f32 (!%p1280_p3), 1.0, %v698_v2  ;;  %v700_v5 = vld [vmem:[%s2326_s11 + $0x30] sm:$0xff] (!%p1280_p3)  ;;  %v701_v6 = vld [vmem:[%s2326_s11 + $0x38] sm:$0xff] (!%p1280_p3) }
  0xd5   : > { %v500_v10 = vpack.c.bf16 %v492_v9, %v490_v8  ;;  %669 = vperm.xlu1 (!%p1280_p3), %1660, %v639_v44   ;;  %664 = vperm.xlu0 (!%p1280_p3), %1659, %v638_v47   ;;  %v1674_v9 = vld [vmem:[%s2612_s15 + $0x30] sm:$0xff] (!%p1280_p3)  }
  0xd6   : > { %1388 = vmatpush3.bf16.msra.mxu0 %v496_v57  ;;  %1464 = vmatpush3.bf16.msra.mxu1 %v496_v57  ;;  %v694_v57 = vld [vmem:[%s2326_s11] sm:$0xff] (!%p1280_p3) }
  0xd7   : > { %1389 = vmatprep.subr.bf16.mxu0 %v497_v62  ;;  %1457 = vmatprep.subr.bf16.mxu1 %v497_v62  ;;  %v702_v61 = vadd.f32 (!%p1280_p3), 1.0, %v694_v57 }
  0xd9   : > { %679 = vperm.xlu1 (!%p1280_p3), %1660, %v641_v50   ;;  %674 = vperm.xlu0 (!%p1280_p3), %1659, %v640_v51   ;;  %1677 = vlog2.f32 (!%p1280_p3), %v702_v61 }
  0xda   : > { %1390 = vmatpush3.bf16.msra.mxu0 %v497_v62  ;;  %1465 = vmatpush3.bf16.msra.mxu1 %v497_v62  ;;  %v703_v62 = vadd.f32 (!%p1280_p3), 1.0, %v695_v58 }
  0xdb   : > { %1391 = vmatprep.subr.bf16.mxu0 %v498_v3  ;;  %1458 = vmatprep.subr.bf16.mxu1 %v498_v3 }
  0xdc   : > { %1679 = vlog2.f32 (!%p1280_p3), %v703_v62 }
  0xdd   : > { %1681 = vlog2.f32 (!%p1280_p3), %v704_v0 }
  0xde   : > { %1392 = vmatpush3.bf16.msra.mxu0 %v498_v3  ;;  %1466 = vmatpush3.bf16.msra.mxu1 %v498_v3  ;;  %v699_v3 = vld [vmem:[%s2326_s11 + $0x28] sm:$0xff] (!%p1280_p3)  ;;  %1683 = vlog2.f32 (!%p1280_p3), %v705_v1 }
  0xdf   : > { %1393 = vmatprep.subr.bf16.mxu0 %v499_v7  ;;  %1459 = vmatprep.subr.bf16.mxu1 %v499_v7  ;;  %v707_v8 = vadd.f32 (!%p1280_p3), 1.0, %v699_v3  ;;  %1685 = vlog2.f32 (!%p1280_p3), %v706_v4 }
  0xe1   : > { %1687 = vlog2.f32 (!%p1280_p3), %v707_v8 }
  0xe2   : > { %1394 = vmatpush3.bf16.msra.mxu0 %v499_v7  ;;  %1467 = vmatpush3.bf16.msra.mxu1 %v499_v7  ;;  %v1673_v7 = vld [vmem:[%s2611_s7 + $0x30] sm:$0xff] (!%p1280_p3)  }
  0xe3   : > { %1395 = vmatprep.subr.bf16.mxu0 %v500_v10  ;;  %1460 = vmatprep.subr.bf16.mxu1 %v500_v10 }
  0xe6   : > { %1396 = vmatpush3.bf16.msra.mxu0 %v500_v10  ;;  %1468 = vmatpush3.bf16.msra.mxu1 %v500_v10  ;;  %v708_v10 = vadd.f32 (!%p1280_p3), 1.0, %v700_v5 }
  0xe7   : > { %1429 = vmatprep.subr.bf16.mxu0 (!%p1280_p3), %v1661_v42  ;;  %1405 = vmatprep.subr.bf16.mxu1 (!%p1280_p3), %v1662_v43 }
  0xe8   : > { %1689 = vlog2.f32 (!%p1280_p3), %v708_v10 }
  0xe9   : > { %1398 = vmatmul.mubr.bf16.vlgmr.msra.gmra.mrb[0].mxu0 %v1625_v11  ;;  %1402 = vmatmul.mubr.bf16.vlgmr.msra.gmra.mrb[0].mxu1 %v1626_v12  ;;  %v709_v11 = vadd.f32 (!%p1280_p3), 1.0, %v701_v6  ;;  %v1675_v12 = vld [vmem:[%s2611_s7 + $0x38] sm:$0xff] (!%p1280_p3)  }
  0xea   : > { %1430 = vmatpush3.bf16.msra.mxu0 (!%p1280_p3), %v1661_v42  ;;  %1406 = vmatpush3.bf16.msra.mxu1 (!%p1280_p3), %v1662_v43 }
  0xeb   : > { %1431 = vmatprep.subr.bf16.mxu0 (!%p1280_p3), %v1663_v45  ;;  %1407 = vmatprep.subr.bf16.mxu1 (!%p1280_p3), %v1664_v46  ;;  %1691 = vlog2.f32 (!%p1280_p3), %v709_v11 }
  0xee   : > { %1432 = vmatpush3.bf16.msra.mxu0 (!%p1280_p3), %v1663_v45  ;;  %1408 = vmatpush3.bf16.msra.mxu1 (!%p1280_p3), %v1664_v46 }
  0xef   : > { %1433 = vmatprep.subr.bf16.mxu0 (!%p1280_p3), %v1665_v48  ;;  %1409 = vmatprep.subr.bf16.mxu1 (!%p1280_p3), %v1666_v49 }
  0xf2   : > { %1434 = vmatpush3.bf16.msra.mxu0 (!%p1280_p3), %v1665_v48  ;;  %1410 = vmatpush3.bf16.msra.mxu1 (!%p1280_p3), %v1666_v49 }
  0xf3   : > { %1435 = vmatprep.subr.bf16.mxu0 (!%p1280_p3), %v1667_v52  ;;  %1411 = vmatprep.subr.bf16.mxu1 (!%p1280_p3), %v1668_v53 }
  0xf6   : > { %1436 = vmatpush3.bf16.msra.mxu0 (!%p1280_p3), %v1667_v52  ;;  %1412 = vmatpush3.bf16.msra.mxu1 (!%p1280_p3), %v1668_v53 }
  0xf7   : > { %1437 = vmatprep.subr.bf16.mxu0 (!%p1280_p3), %v1669_v54  ;;  %1413 = vmatprep.subr.bf16.mxu1 (!%p1280_p3), %v1670_v55 }
  0xfa   : > { %1438 = vmatpush3.bf16.msra.mxu0 (!%p1280_p3), %v1669_v54  ;;  %1414 = vmatpush3.bf16.msra.mxu1 (!%p1280_p3), %v1670_v55 }
  0xfb   : > { %1439 = vmatprep.subr.bf16.mxu0 (!%p1280_p3), %v1671_v56  ;;  %1415 = vmatprep.subr.bf16.mxu1 (!%p1280_p3), %v1672_v60 }
  0xfe   : > { %1440 = vmatpush3.bf16.msra.mxu0 (!%p1280_p3), %v1671_v56  ;;  %1416 = vmatpush3.bf16.msra.mxu1 (!%p1280_p3), %v1672_v60 }
  0xff   : > { %1441 = vmatprep.subr.bf16.mxu0 (!%p1280_p3), %v1673_v7  ;;  %1417 = vmatprep.subr.bf16.mxu1 (!%p1280_p3), %v1674_v9 }
 0x102   : > { %1442 = vmatpush3.bf16.msra.mxu0 (!%p1280_p3), %v1673_v7  ;;  %1418 = vmatpush3.bf16.msra.mxu1 (!%p1280_p3), %v1674_v9  ;;  %v1297_v7 = vld [vmem:[%s2613_s29] ss:$0 sm:$0xff] (!%p1280_p3) }
 0x103   : > { %1443 = vmatprep.subr.bf16.mxu0 (!%p1280_p3), %v1675_v12 }
 0x106   : > { %1444 = vmatpush3.bf16.msra.mxu0 (!%p1280_p3), %v1675_v12 }
 0x1bc   : > { %v1399_v17 = vpop.f32.mrb[0].mxu0  ;;  %v1403_v18 = vpop.f32.mrb[0].mxu1  ;;  %625 = sbr.rel (%p1280_p3) target bundleno = 859 (0x35b), region = 68 }
 0x1bd   : > { %v608_v21 = vadd.f32 %v1399_v17, %v503_v13  ;;  %v612_v22 = vadd.f32 %v1403_v18, %v507_v14  ;;  %v575_v23 = vpop.f32.mrb[1].mxu0  ;;  %v591_v24 = vpop.f32.mrb[1].mxu1  ;;  %v1676_v13 = vld [vmem:[%s2612_s15 + $0x38] sm:$0xff] (!%p1280_p3)  }
 0x1be   : > { %v606_v27 = vadd.f32 %v575_v23, %v501_v15  ;;  %v610_v28 = vadd.f32 %v591_v24, %v505_v16  ;;  %v1400_v29 = vpop.f32.mrb[2].mxu0  ;;  %v1404_v30 = vpop.f32.mrb[2].mxu1  ;;  %1419 = vmatprep.subr.bf16.mxu1 (!%p1280_p3), %v1676_v13 }
 0x1bf   : > { %616 = vst [vmem:[#allocation2 + $0x10] sm:$0xff] %v608_v21  ;;  %620 = vst [vmem:[#allocation2 + $0x30] sm:$0xff] %v612_v22  ;;  %v609_v31 = vadd.f32 %v1400_v29, %v504_v19  ;;  %v613_v32 = vadd.f32 %v1404_v30, %v508_v20  ;;  %v578_v33 = vpop.f32.mrb[3].mxu0  ;;  %v594_v34 = vpop.f32.mrb[3].mxu1  ;;  %1420 = vmatpush3.bf16.msra.mxu1 (!%p1280_p3), %v1676_v13 }
 0x1c0   : > { %614 = vst [vmem:[#allocation2] sm:$0xff] %v606_v27  ;;  %618 = vst [vmem:[#allocation2 + $0x20] sm:$0xff] %v610_v28  ;;  %v607_v35 = vadd.f32 %v578_v33, %v502_v25  ;;  %v611_v36 = vadd.f32 %v594_v34, %v506_v26  ;;  %v1678_v14 = vpop.eup (!%p1280_p3), %1677  ;;  %v655_v34 = vpop.permute.xlu1 (!%p1280_p3), %654 }
 0x1c1   : > { %617 = vst [vmem:[#allocation2 + $0x18] sm:$0xff] %v609_v31  ;;  %621 = vst [vmem:[#allocation2 + $0x38] sm:$0xff] %v613_v32  ;;  %v1680_v15 = vpop.eup (!%p1280_p3), %1679  ;;  %v711_v16 = vmul.f32 (!%p1280_p3), 0.6931472, %v1678_v14 }
 0x1c2   : > { %615 = vst [vmem:[#allocation2 + $0x8] sm:$0xff] %v607_v35  ;;  %619 = vst [vmem:[#allocation2 + $0x28] sm:$0xff] %v611_v36  ;;  %v1682_v17 = vpop.eup (!%p1280_p3), %1681  ;;  %v713_v18 = vmul.f32 (!%p1280_p3), 0.6931472, %v1680_v15  ;;  %v645_v35 = vpop.permute.xlu0 (!%p1280_p3), %644 }
 0x1c3   : > { %v1684_v19 = vpop.eup %1683  ;;  %v715_v20 = vmul.f32 0.6931472, %v1682_v17 }
 0x1c4   : > { %v1686_v21 = vpop.eup %1685  ;;  %v726_v22 = vpack.c.bf16 %v713_v18, %v711_v16  ;;  %v717_v23 = vmul.f32 0.6931472, %v1684_v19  ;;  %v660_v40 = vpop.permute.xlu1 %659 }
 0x1c5   : > { %v1688_v24 = vpop.eup %1687  ;;  %v719_v25 = vmul.f32 0.6931472, %v1686_v21 }
 0x1c6   : > { %v1690_v26 = vpop.eup %1689  ;;  %1445 = vmatprep.mubr.bf16.mxu0 %v726_v22  ;;  %v727_v27 = vpack.c.bf16 %v717_v23, %v715_v20  ;;  %v721_v28 = vmul.f32 0.6931472, %v1688_v24  ;;  %v628_v36 = vld [vmem:[#allocation2 + $0x10] sm:$0xff]  ;;  %v650_v41 = vpop.permute.xlu0 %649 }
 0x1c7   : > { %v1692_v29 = vpop.eup %1691  ;;  %v723_v31 = vmul.f32 0.6931472, %v1690_v26  ;;  %v626_v37 = vld [vmem:[#allocation2] sm:$0xff]  ;;  %v684_v42 = vmul.f32 %v655_v34, %v628_v36  ;;  %v632_v55 = vld [vmem:[#allocation2 + $0x30] sm:$0xff] }
 0x1c8   : > { %1446 = vmatmul.mubr.bf16.vlgmr.msra.gmra.mrb[0].mxu0 %v727_v27  ;;  %v728_v30 = vpack.c.bf16 %v721_v28, %v719_v25  ;;  %v725_v32 = vmul.f32 0.6931472, %v1692_v29  ;;  %v629_v38 = vld [vmem:[#allocation2 + $0x18] sm:$0xff]  ;;  %v682_v43 = vmul.f32 %v645_v35, %v626_v37  ;;  %v630_v47 = vld [vmem:[#allocation2 + $0x20] sm:$0xff]  ;;  %v670_v50 = vpop.permute.xlu1 %669 }
 0x1c9   : > { %v627_v39 = vld [vmem:[#allocation2 + $0x8] sm:$0xff]  ;;  %v685_v44 = vmul.f32 %v660_v40, %v629_v38  ;;  %v633_v54 = vld [vmem:[#allocation2 + $0x38] sm:$0xff] }
 0x1ca   : > { %1449 = vmatprep.mubr.bf16.mxu0 %v728_v30  ;;  %v729_v33 = vpack.c.bf16 %v725_v32, %v723_v31  ;;  %v683_v45 = vmul.f32 %v650_v41, %v627_v39  ;;  %v631_v46 = vld [vmem:[#allocation2 + $0x28] sm:$0xff]  ;;  %v665_v51 = vpop.permute.xlu0 %664 }
 0x1cb   : > { %v691_v48 = vpack.c.bf16 %v685_v44, %v684_v42  ;;  %v687_v52 = vmul.f32 %v670_v50, %v631_v46  ;;  %v686_v53 = vmul.f32 %v665_v51, %v630_v47 }
 0x1cc   : > { %v690_v49 = vpack.c.bf16 %v683_v45, %v682_v43  ;;  %v680_v57 = vpop.permute.xlu1 %679 }
 0x1cd   : > { %v692_v56 = vpack.c.bf16 %v687_v52, %v686_v53  ;;  %v689_v59 = vmul.f32 %v680_v57, %v633_v54 }
 0x1ce   : > { %1421 = vmatprep.mubr.bf16.mxu1 %v690_v49  ;;  %v675_v58 = vpop.permute.xlu0 %674 }
 0x1cf   : > { %1422 = vmatmul.mubr.bf16.vlgmr.msra.gmra.mrb[0].mxu1 %v691_v48  ;;  %v688_v60 = vmul.f32 %v675_v58, %v632_v55 }
 0x1d0   : > { %1450 = vmatmul.mubr.bf16.gmra.mrb[4].mxu0 %v729_v33  ;;  %1425 = vmatprep.mubr.bf16.mxu1 %v692_v56 }
 0x1d1   : > { %v693_v61 = vpack.c.bf16 %v689_v59, %v688_v60 }
 0x1d7   : > { %1426 = vmatmul.mubr.bf16.gmra.mrb[4].mxu1 %v693_v61 }
 0x29b   : > { %v1447_v62 = vpop.f32.mrb[0].mxu0 }
 0x29c   : > { %v957_v63 = vpop.f32.mrb[1].mxu0 }
 0x29d   : > { %v1448_v0 = vpop.f32.mrb[2].mxu0 }
 0x29e   : > { %v960_v1 = vpop.f32.mrb[3].mxu0 }
 0x2a2   : > { %v1423_v6 = vpop.f32.mrb[0].mxu1 }
 0x2a3   : > { %v1451_v2 = vpop.f32.mrb[4].mxu0  ;;  %v966_v8 = vadd.f32 %v1447_v62, %v1423_v6  ;;  %v844_v9 = vpop.f32.mrb[1].mxu1 }
 0x2a4   : > { %v973_v3 = vpop.f32.mrb[5].mxu0  ;;  %v958_v10 = vadd.f32 %v957_v63, %v844_v9  ;;  %v1424_v11 = vpop.f32.mrb[2].mxu1 }
 0x2a5   : > { %v1452_v4 = vpop.f32.mrb[6].mxu0  ;;  %v997_v12 = vadd.f32 %v1297_v7, %v966_v8  ;;  %v969_v13 = vadd.f32 %v1448_v0, %v1424_v11  ;;  %v847_v14 = vpop.f32.mrb[3].mxu1 }
 0x2a6   : > { %v976_v5 = vpop.f32.mrb[7].mxu0  ;;  %v995_v15 = vadd.f32 %v1297_v7, %v958_v10  ;;  %v961_v16 = vadd.f32 %v960_v1, %v847_v14 }
 0x2a7   : > { %v2445_v17 = vmax.f32 %v997_v12, 0.0  ;;  %v998_v20 = vadd.f32 %v1297_v7, %v969_v13 }
 0x2a8   : > { %v996_v18 = vadd.f32 %v1297_v7, %v961_v16  ;;  %v1003_v19 = vmax.f32 %v995_v15, 0.0 }
 0x2a9   : > { %v1013_v21 = vmul.f32 %v2445_v17, %v2445_v17  ;;  %v1006_v29 = vmax.f32 %v998_v20, 0.0 }
 0x2aa   : > { %v1004_v22 = vmax.f32 %v996_v18, 0.0  ;;  %v1427_v23 = vpop.f32.mrb[4].mxu1  ;;  %v1011_v32 = vmul.f32 %v1003_v19, %v1003_v19 }
 0x2ab   : > { %v982_v24 = vadd.f32 %v1451_v2, %v1427_v23  ;;  %1023 = vadd.xlane.f32.xlu0 %v1013_v21  ;;  %v860_v25 = vpop.f32.mrb[5].mxu1  ;;  %v1014_v39 = vmul.f32 %v1006_v29, %v1006_v29 }
 0x2ac   : > { %v974_v26 = vadd.f32 %v973_v3, %v860_v25  ;;  %v1428_v27 = vpop.f32.mrb[6].mxu1  ;;  %v1012_v28 = vmul.f32 %v1004_v22, %v1004_v22 }
 0x2ad   : > { %v985_v30 = vadd.f32 %v1452_v4, %v1428_v27  ;;  %v863_v31 = vpop.f32.mrb[7].mxu1  ;;  %v1001_v33 = vadd.f32 %v1297_v7, %v982_v24 }
 0x2ae   : > { %v999_v34 = vadd.f32 %v1297_v7, %v974_v26  ;;  %v977_v35 = vadd.f32 %v976_v5, %v863_v31  ;;  %1021 = vadd.xlane.f32.xlu1 %v1012_v28 }
 0x2af   : > { %1019 = vadd.xlane.f32.xlu0 %v1011_v32  ;;  %v1002_v38 = vadd.f32 %v1297_v7, %v985_v30  ;;  %v1009_v40 = vmax.f32 %v1001_v33, 0.0 }
 0x2b0   : > { %v1007_v36 = vmax.f32 %v999_v34, 0.0  ;;  %v1000_v37 = vadd.f32 %v1297_v7, %v977_v35 }
 0x2b1   : > { %v1010_v44 = vmax.f32 %v1002_v38, 0.0  ;;  %v1017_v45 = vmul.f32 %v1009_v40, %v1009_v40 }
 0x2b2   : > { %v1008_v41 = vmax.f32 %v1000_v37, 0.0  ;;  %v1015_v42 = vmul.f32 %v1007_v36, %v1007_v36 }
 0x2b3   : > { %1025 = vadd.xlane.f32.xlu0 %v1014_v39  ;;  %v1018_v46 = vmul.f32 %v1010_v44, %v1010_v44 }
 0x2b4   : > { %1027 = vadd.xlane.f32.xlu1 %v1015_v42  ;;  %v1016_v43 = vmul.f32 %v1008_v41, %v1008_v41 }
 0x2b7   : > { %1029 = vadd.xlane.f32.xlu0 %v1016_v43 }
 0x2b8   : > { %1031 = vadd.xlane.f32.xlu1 %v1017_v45 }
 0x2bb   : > { %1033 = vadd.xlane.f32.xlu0 %v1018_v46 }
 0x338   : > { %v1024_v47 = vpop.xlane.xlu0 %1023 }
 0x339   : > { %v1037_v51 = vmax.f32 %v1024_v47, 1e-24 }
 0x33b   : > { %v1022_v48 = vpop.xlane.xlu1 %1021 }
 0x33c   : > { %v1036_v49 = vmax.f32 %v1022_v48, 1e-24  ;;  %v1020_v50 = vpop.xlane.xlu0 %1019 }
 0x33d   : > { %v1035_v52 = vmax.f32 %v1020_v50, 1e-24 }
 0x33e   : > { %1693 = vrsqrt.f32 %v1036_v49 }
 0x33f   : > { %1695 = vrsqrt.f32 %v1035_v52 }
 0x340   : > { %v1026_v53 = vpop.xlane.xlu0 %1025  ;;  %1697 = vrsqrt.f32 %v1037_v51 }
 0x341   : > { %v1038_v54 = vmax.f32 %v1026_v53, 1e-24  ;;  %v1028_v55 = vpop.xlane.xlu1 %1027 }
 0x342   : > { %v1039_v56 = vmax.f32 %v1028_v55, 1e-24 }
 0x343   : > { %1699 = vrsqrt.f32 %v1038_v54 }
 0x344   : > { %v1030_v57 = vpop.xlane.xlu0 %1029  ;;  %1701 = vrsqrt.f32 %v1039_v56 }
 0x345   : > { %v1040_v58 = vmax.f32 %v1030_v57, 1e-24  ;;  %v1032_v59 = vpop.xlane.xlu1 %1031 }
 0x346   : > { %v1041_v60 = vmax.f32 %v1032_v59, 1e-24 }
 0x347   : > { %1703 = vrsqrt.f32 %v1040_v58 }
 0x348   : > { %v1694_v61 = vpop.eup %1693  ;;  %v1034_v62 = vpop.xlane.xlu0 %1033  ;;  %1705 = vrsqrt.f32 %v1041_v60 }
 0x349   : > { %v1696_v63 = vpop.eup %1695  ;;  %v1052_v0 = vmul.f32 %v1694_v61, %v1004_v22  ;;  %v1042_v1 = vmax.f32 %v1034_v62, 1e-24 }
 0x34a   : > { %v1051_v2 = vmul.f32 %v1696_v63, %v1003_v19  ;;  %v1698_v3 = vpop.eup %1697 }
 0x34b   : > { %1707 = vrsqrt.f32 %v1042_v1  ;;  %v1053_v6 = vmul.f32 %v1698_v3, %v2445_v17 }
 0x34c   : > { %v1325_v4 = vpack.c.bf16 %v1052_v0, %v1051_v2 }
 0x34d   : > { %v1700_v5 = vpop.eup %1699 }
 0x34e   : > { %1326 = vst [vmem:[%s2354_s22] sm:$0xff] %v1325_v4   ;;  %v1054_v7 = vmul.f32 %v1700_v5, %v1006_v29  ;;  %v1702_v8 = vpop.eup %1701 }
 0x34f   : > { %v1055_v11 = vmul.f32 %v1702_v8, %v1007_v36 }
 0x350   : > { %v1330_v9 = vpack.c.bf16 %v1054_v7, %v1053_v6 }
 0x351   : > { %v1704_v10 = vpop.eup %1703 }
 0x352   : > { %1342 = vst [vmem:[%s2354_s22 + $0x8] sm:$0xff] %v1330_v9   ;;  %v1056_v12 = vmul.f32 %v1704_v10, %v1008_v41  ;;  %v1706_v13 = vpop.eup %1705 }
 0x353   : > { %v1057_v16 = vmul.f32 %v1706_v13, %v1009_v40 }
 0x354   : > { %v1335_v14 = vpack.c.bf16 %v1056_v12, %v1055_v11 }
 0x355   : > { %v1708_v15 = vpop.eup %1707 }
 0x356   : > { %1343 = vst [vmem:[%s2354_s22 + $0x10] sm:$0xff] %v1335_v14   ;;  %v1058_v18 = vmul.f32 %v1708_v15, %v1010_v44 }
 0x358   : > { %v1340_v19 = vpack.c.bf16 %v1058_v18, %v1057_v16 }
 0x35a   : > { %1344 = vst [vmem:[%s2354_s22 + $0x18] sm:$0xff] %v1340_v19  }
 0x35b PF: > { %s2614_s3 = sld [smem:[#allocation17_spill]]  ;;  %s2615_s24 = sld [smem:[#allocation28_spill]] }
 0x35c   : > { %s1113_s11 = sshll.u32 %s2354_s22, 4  ;;  %s1100_s10 = scalar_lea.sflag [#allocation5], %s2322_s21  ;;  %s2461_s11 = int_to_ptr.vmem [resolvable:$true] %s1113_s11 }
 0x35d   : > { %s1799_s27 = scalar_lea.vmem %s2461_s11, 512  ;;  %p2617_p4 = scmp.ne.s32.totalorder %s2590_s17, 0 }
 0x35e   : > { %p1800_p7 = scmp.ne.s32.totalorder %s2461_s11, %s1799_s27  ;;  %s1965_s20 = smov [#allocation9]  }
 0x35f   : > { %s1803_s0 = sshll.u32 %s1965_s20, 4  ;;  %s1804_s0 = int_to_ptr.vmem [resolvable:$false] %s1803_s0 }
 0x360   : > { %p1801_p1 = pnand %p1800_p7, %p2617_p4  ;;  %s1805_s18 = scalar_lea.vmem %s1804_s0, 1024 }
 0x361   : > { %s1321_s6 = sshll.u32 %s2614_s3, 9  ;;  %s2616_s4 = smov %s2615_s24 }
 0x362   : > { %s2458_s30 = scalar_lea.hbm %s2615_s24, %s1321_s6  ;;  %p1802_p10 = pneg %p1801_p1 }
 0x363   : > { %p1806_p12 = scmp.lt.s32.totalorder %s2461_s11, %s1804_s0  ;;  %p1807_p6 = scmp.lt.s32.totalorder %s1805_s18, %s1799_s27 }
 0x365   : > { %p1808_p2 = por %p1807_p6, %p1806_p12 }
 0x367   : > { %p1809_p8 = pnand %p1808_p2, %p1802_p10 }
 0x369   : > { %1812 = shalt.err (!%p1809_p8)
}
 0x36a   : > { %s1813_s22 = scalar_lea.hbm %s2458_s30, 512  ;;  %s1817_s6 = scalar_lea.hbm %s2616_s4, 1024 }
 0x36b   : > { %p1814_p13 = scmp.ne.s32.totalorder %s2458_s30, %s1813_s22  ;;  %p1818_p0 = scmp.lt.u32.totalorder %s2458_s30, %s2616_s4 }
 0x36c   : > { %p1819_p5 = scmp.lt.u32.totalorder %s1817_s6, %s1813_s22  ;;  %p1821_p7 = scmp.lt.u32.totalorder %s1813_s22, %s2458_s30 }
 0x36d   : > { %p1815_p9 = pnand %p1814_p13, %p2617_p4 }
 0x36e   : > { %p1820_p3 = por %p1819_p5, %p1818_p0 }
 0x36f   : > { %p1816_p11 = pneg %p1815_p9 }
 0x370   : > { %p1822_p1 = por %p1821_p7, %p1820_p3 }
 0x372   : > { %p1823_p10 = pnand %p1822_p1, %p1816_p11 }
 0x374   : > { %1826 = shalt.err (!%p1823_p10)
}
 0x375   : > { %s1966_s24 = smov 64   ;;  %s1967_s27 = smov 4  }
 0x376   : > { %1484 = dma.vmem_to_hbm [thread:$0]  (%p2617_p4), %s2461_s11, 512, %s2458_s30, %s1100_s10, %s1966_s24, %s1966_s24, %s1967_s27  }
 0x377 PF: > { %s2618_s20 = sld [smem:[#allocation15_spill]]  ;;  %p1501_p12 = scmp.ge.s32.totalorder %s1953_s14, 2 }
 0x378   : > { %p2619_p6 = scmp.ne.s32.totalorder %s2592_s23, 0 }
 0x37a   : > { %p1497_p2 = pnand %p1501_p12, %p2619_p6 }
 0x37d   : > { %s1128_s0 = sand.u32 1, %s2618_s20  }
 0x37e   : > { %s1129_s18 = scalar_lea.sflag [#allocation5], %s1128_s0 }
 0x37f   : > { %1896 = dma.done.wait (!%p1497_p2), %s1129_s18, 512  }
 0x380   : > { %1898 = vsyncadd (!%p1497_p2), %s1129_s18, 4294966784  ;;  %s26_s14 = sadd.s32 1, %s1953_s14   ;;  %s2621_s17 = sld [smem:[#allocation14_spill]] }
 0x381   : > { %p2492_p8 = scmp.ge.s32.totalorder %s26_s14, 8   ;;  %s2622_s29 = sld [smem:[#allocation20_spill]] }
 0x382   : > { %s2623_s23 = sld [smem:[#allocation18_spill]]  ;;  %s2624_s21 = sld [smem:[#allocation21_spill]] }
 0x383   : > { %s2625_s24 = smov %s1905_s25  ;;  %s2626_s25 = smov %s1909_s26 }
 0x384   : > { %s2627_s26 = smov %s2265_s5  ;;  %s2628_s27 = smov %s1917_s28 }
 0x385   : > { %s2630_s30 = smov %s1929_s8  ;;  %s2631_s8 = smov %s1933_s9 }
 0x386   : > { %s2629_s28 = smov %s2621_s17  ;;  %s2632_s9 = smov %s2209_s1 }
 0x387   : > { %s2633_s10 = smov %s1945_s12  ;;  %s2634_s11 = smov %s1949_s13 }
 0x388   : > { %s2635_s12 = smov %s2623_s23  ;;  %s2636_s13 = smov %s2624_s21 }
 0x389   :  { %25 = sbr.rel (!%p2492_p8) target bundleno = 20 (0x14), region = 128 }
 0x390   :  { %1134 = vsyncpa [#allocation4], 1 }
 0x391   :  { %1136 = vsyncpa [#allocation4 + $0x1], 1 }
 0x392   :  { %1137 = vsyncpa [#allocation7], 1 }
 0x393   :  { %1139 = vsyncpa [#allocation7 + $0x1], 1 }
 0x394   :  { %1140 = vsyncpa [#allocation5], 1 }
 0x395   :  { %1142 = vsyncpa [#allocation5 + $0x1], 1 }

</bundles_post_ra>
